<compile_context>
chip_gen: v5e
topology: v5e:2x2
jax: 0.10.0
libtpu: 0.0.40
codegen_flags: <defaults>
</compile_context>

<pallas_src>
import jax
import jax.numpy as jnp
from jax.experimental import pallas as pl
from jax.experimental.pallas import tpu as pltpu


# --------------------------------------------------------------------------
# Path 1: scalar-prefetch DMA row-gather (table stays in HBM).
# --------------------------------------------------------------------------
def _gather_kernel(ids_ref, table_hbm, out_ref, sem_ref):
    # ids_ref   : (n_pad,) int32   SMEM  (scalar-prefetched token ids)
    # table_hbm : (V, D)   table   HBM   (memory_space=pl.ANY, never in VMEM)
    # out_ref   : (TG, D)  table   VMEM  (output tile for this grid step)
    # sem_ref   : DMA semaphore (shared by all row copies of this tile)
    i = pl.program_id(0)
    tg = out_ref.shape[0]
    base = i * tg

    # Issue all TG row DMAs (HBM row -> output-tile row), then wait on all of
    # them; every byte of out_ref is overwritten, padded slots read row 0.
    def _start(t, carry):
        row = ids_ref[base + t]
        pltpu.make_async_copy(table_hbm.at[row], out_ref.at[t], sem_ref).start()
        return carry

    jax.lax.fori_loop(0, tg, _start, 0)

    def _wait(t, carry):
        # Same-sized descriptor; only the destination size matters for wait.
        pltpu.make_async_copy(table_hbm.at[0], out_ref.at[t], sem_ref).wait()
        return carry

    jax.lax.fori_loop(0, tg, _wait, 0)


# --------------------------------------------------------------------------
# Path 2: VMEM-resident one-hot matmul (tiny vocab only, single vocab chunk,
# no accumulator scratch, table DMA'd once thanks to the constant block idx).
# --------------------------------------------------------------------------
def _onehot_kernel(ids_ref, emb_ref, out_ref):
    # ids_ref : (TN, 1)   int32        VMEM
    # emb_ref : (Vp, D)   table dtype  VMEM (resident: block index constant)
    # out_ref : (TN, D)   table dtype  VMEM
    tn = ids_ref.shape[0]
    vp = emb_ref.shape[0]
    ids = ids_ref[...]                                           # (TN, 1)
    col = jax.lax.broadcasted_iota(jnp.int32, (tn, vp), 1)       # (TN, Vp)
    # 0/1 is exact in bf16 and f32, so the matmul reproduces the gather
    # bit-exactly in the table's own dtype.
    onehot = (ids == col).astype(emb_ref.dtype)                  # (TN, Vp)
    out_ref[...] = jnp.dot(
        onehot, emb_ref[...], preferred_element_type=jnp.float32
    ).astype(out_ref.dtype)


# --------------------------------------------------------------------------
# Wrapper
# --------------------------------------------------------------------------
def traj_sim_embed(tokens, emb_table, *, mode="auto", tile_tokens=256,
                   onehot_table_budget_bytes=2 * 1024 * 1024):
    """tokens: (seq_len, batch) integer ids; emb_table: (vocab_size, d_model).

    Returns (seq_len, batch, d_model), matching TrajSimEmbed.forward.
    mode: "auto" | "gather" | "onehot".
    """
    S, B = tokens.shape
    V, D = emb_table.shape
    N = S * B
    dtype_bytes = jnp.dtype(emb_table.dtype).itemsize

    # Token tile: multiple of 8 (layout constraint), capped at tile_tokens and
    # at the (rounded-up) token count.  No halving loop -> the multiple-of-8
    # invariant can never be broken.
    tg = min(max(8, (tile_tokens // 8) * 8), pl.cdiv(N, 8) * 8)
    n_pad = pl.cdiv(N, tg) * tg

    v_pad = pl.cdiv(V, 8) * 8
    table_bytes = v_pad * D * dtype_bytes

    if mode == "auto":
        use_onehot = (table_bytes <= onehot_table_budget_bytes) and (V <= 2048)
    elif mode == "onehot":
        use_onehot = True
    elif mode == "gather":
        use_onehot = False
    else:
        raise ValueError(f"unknown mode: {mode}")

    if use_onehot:
        ids = tokens.reshape(N, 1).astype(jnp.int32)
        if n_pad != N:
            # Padded slots get id -1 -> no one-hot match -> zero rows (sliced
            # off below).
            ids = jnp.pad(ids, ((0, n_pad - N), (0, 0)), constant_values=-1)
        table = emb_table
        if v_pad != V:
            table = jnp.pad(table, ((0, v_pad - V), (0, 0)))  # never matched

        cost = pl.CostEstimate(
            flops=2 * n_pad * v_pad * D,
            transcendentals=0,
            bytes_accessed=table_bytes + n_pad * 4 + n_pad * D * dtype_bytes)

        # Per-step VMEM: resident table (+double buffer headroom), ids tile,
        # output tile, (TN, Vp) one-hot temp.  Small by construction (table
        # budget <= 2 MiB); the explicit limit is safe on every generation
        # (<= 64 MiB physical on v7x).
        vmem_needed = int(2 * table_bytes + 2 * tg * 4
                          + 2 * tg * D * dtype_bytes
                          + tg * v_pad * dtype_bytes + (1 << 20))
        vmem_limit = int(min(64 * 1024 * 1024,
                             max(16 * 1024 * 1024, vmem_needed)))

        out_flat = pl.pallas_call(
            _onehot_kernel,
            out_shape=jax.ShapeDtypeStruct((n_pad, D), emb_table.dtype),
            grid=(n_pad // tg,),
            in_specs=[
                pl.BlockSpec((tg, 1), lambda i: (i, 0)),      # token-id tile
                pl.BlockSpec((v_pad, D), lambda i: (0, 0)),   # resident table
            ],
            out_specs=pl.BlockSpec((tg, D), lambda i: (i, 0)),
            compiler_params=pltpu.CompilerParams(
                dimension_semantics=("parallel",),
                vmem_limit_bytes=vmem_limit),
            cost_estimate=cost,
        )(ids, table)
    else:
        # Clamp ids into range so every row DMA is in-bounds (nn.Embedding
        # would raise on out-of-range ids); padded slots read row 0 and are
        # sliced away below.
        ids = jnp.clip(tokens.reshape(N).astype(jnp.int32), 0, V - 1)
        if n_pad != N:
            ids = jnp.pad(ids, (0, n_pad - N))

        cost = pl.CostEstimate(
            flops=0,
            transcendentals=0,
            bytes_accessed=2 * n_pad * D * dtype_bytes + n_pad * 4)

        out_flat = pl.pallas_call(
            _gather_kernel,
            out_shape=jax.ShapeDtypeStruct((n_pad, D), emb_table.dtype),
            grid_spec=pltpu.PrefetchScalarGridSpec(
                num_scalar_prefetch=1,
                grid=(n_pad // tg,),
                in_specs=[pl.BlockSpec(memory_space=pl.ANY)],  # table in HBM
                out_specs=pl.BlockSpec((tg, D), lambda i, ids: (i, 0)),
                scratch_shapes=[pltpu.SemaphoreType.DMA]),
            compiler_params=pltpu.CompilerParams(
                dimension_semantics=("parallel",)),
            cost_estimate=cost,
        )(ids, emb_table)

    if n_pad != N:
        out_flat = out_flat[:N]
    return out_flat.reshape(S, B, D)


if __name__ == "__main__":
    # Small synthetic configuration consistent with the module:
    #   vocab_size = 64, d_model = 32, PAD = 0, seq_len = 8, batch = 2
    VOCAB, D_MODEL, PAD = 64, 32, 0
    SEQ_LEN, BATCH = 8, 2

    key = jax.random.PRNGKey(0)
    k_emb, k_tok = jax.random.split(key)

    # Deterministic "pretrained" embedding table; padding_idx row zeroed,
    # exactly like nn.Embedding(padding_idx=PAD).
    emb_table = jax.random.normal(k_emb, (VOCAB, D_MODEL), dtype=jnp.float32)
    emb_table = emb_table.at[PAD].set(0.0)

    # Padded token sequence (seq_len, batch); include some PAD tokens.
    tokens = jax.random.randint(k_tok, (SEQ_LEN, BATCH), 0, VOCAB,
                                dtype=jnp.int32)
    tokens = tokens.at[-2:, :].set(PAD)  # trailing padding, like a packed seq

    ref = jnp.take(emb_table, tokens, axis=0)  # nn.Embedding.forward

    # 1) Auto path (tiny vocab -> VMEM-resident one-hot, no accumulator).
    out = jax.block_until_ready(traj_sim_embed(tokens, emb_table))
    assert out.shape == (SEQ_LEN, BATCH, D_MODEL), out.shape
    assert jnp.allclose(out, ref, atol=1e-6), "one-hot path mismatch"
    assert jnp.all(out[-1, :, :] == 0.0), "PAD rows must embed to zeros"

    # 2) Force the scalar-prefetch DMA row-gather path (the production path
    #    for realistic vocab sizes) and check it is bit-exact too.
    out_g = jax.block_until_ready(
        traj_sim_embed(tokens, emb_table, mode="gather"))
    assert jnp.allclose(out_g, ref, atol=0.0), "gather path mismatch"
    assert jnp.all(out_g[-1, :, :] == 0.0), "PAD rows must embed to zeros"

    # 3) Token-tile padding with a non-multiple-of-8 token count, both paths.
    tokens_odd = jax.random.randint(jax.random.PRNGKey(1), (7, 3), 0, VOCAB,
                                    dtype=jnp.int32)
    ref_odd = jnp.take(emb_table, tokens_odd, axis=0)
    out_odd = jax.block_until_ready(traj_sim_embed(tokens_odd, emb_table))
    assert out_odd.shape == (7, 3, D_MODEL), out_odd.shape
    assert jnp.allclose(out_odd, ref_odd, atol=1e-6), "padded one-hot mismatch"
    out_odd_g = jax.block_until_ready(
        traj_sim_embed(tokens_odd, emb_table, mode="gather"))
    assert jnp.allclose(out_odd_g, ref_odd, atol=0.0), "padded gather mismatch"

    print("KERNEL_OK")
</pallas_src>

<mosaic_0001>
module attributes {stable_mosaic.version = 11 : i64} {
  func.func @_onehot_kernel(%arg0: i32, %arg1: memref<16x1xi32, #tpu.memory_space<vmem>>, %arg2: memref<64x32xf32, #tpu.memory_space<vmem>>, %arg3: memref<16x32xf32, #tpu.memory_space<vmem>>) attributes {dimension_semantics = [#tpu.dimension_semantics<parallel>], iteration_bounds = array<i64: 1>, scalar_prefetch = 0 : i64, scratch_operands = 0 : i64, tpu.core_type = #tpu.core_type<tc>, window_params = [{transform_indices = @transform_0, window_bounds = array<i64: 16, 1>}, {pipeline_mode = #tpu.pipeline_mode<synchronous>, transform_indices = @transform_1, window_bounds = array<i64: 64, 32>}, {transform_indices = @transform_2, window_bounds = array<i64: 16, 32>}]} {
    %c0 = arith.constant 0 : index
    %c0_0 = arith.constant 0 : index
    %0 = vector.load %arg1[%c0, %c0_0] : memref<16x1xi32, #tpu.memory_space<vmem>>, vector<16x1xi32>
    %1 = tpu.iota {dimensions = array<i32: 1>} : vector<16x64xi32>
    %2 = vector.broadcast %0 : vector<16x1xi32> to vector<16x64xi32>
    %3 = arith.cmpi eq, %2, %1 : vector<16x64xi32>
    %4 = arith.extui %3 : vector<16x64xi1> to vector<16x64xi32>
    %5 = arith.sitofp %4 : vector<16x64xi32> to vector<16x64xf32>
    %c0_1 = arith.constant 0 : index
    %c0_2 = arith.constant 0 : index
    %6 = vector.load %arg2[%c0_1, %c0_2] : memref<64x32xf32, #tpu.memory_space<vmem>>, vector<64x32xf32>
    %cst = arith.constant dense<0.000000e+00> : vector<16x32xf32>
    %7 = tpu.matmul %5, %6, %cst {dimension_numbers = #tpu.dot_dimension_numbers<[1], [0], [0], [1], [0, 0, 1, 1], [], []>} : vector<16x64xf32>, vector<64x32xf32>, vector<16x32xf32> -> vector<16x32xf32>
    %c0_3 = arith.constant 0 : index
    %c0_4 = arith.constant 0 : index
    %8 = vector.load %arg3[%c0_3, %c0_4] : memref<16x32xf32, #tpu.memory_space<vmem>>, vector<16x32xf32>
    tpu.vector_store %arg3[%c0_3, %c0_4], %7 {strides = array<i32>} : memref<16x32xf32, #tpu.memory_space<vmem>>, vector<16x32xf32>,
    return
  }
  func.func @transform_0(%arg0: i32) -> (i32, i32) {
    %c0_i32 = arith.constant 0 : i32
    %c0_i32_0 = arith.constant 0 : i32
    return %arg0, %c0_i32 : i32, i32
  }
  func.func @transform_1(%arg0: i32) -> (i32, i32) {
    %c0_i32 = arith.constant 0 : i32
    %c0_i32_0 = arith.constant 0 : i32
    %c0_i32_1 = arith.constant 0 : i32
    return %c0_i32, %c0_i32_0 : i32, i32
  }
  func.func @transform_2(%arg0: i32) -> (i32, i32) {
    %c0_i32 = arith.constant 0 : i32
    %c0_i32_0 = arith.constant 0 : i32
    return %arg0, %c0_i32 : i32, i32
  }
}

</mosaic_0001>

<bundles_post_ra>
// kernel: tpu_custom_call.1
= control target key start
LH: loop header
LB: loop body
LE: loop exit
PB: predicated region body
PF: predicated region fallthrough
CT: control target
= control target key end

     0   :  { %v131_v2 = vmov 0   ;;  %s184_s0 = inlined_call_operand.vmem [shape: s32[16,1], index: 0, kind: input, shape index: {}]   ;;  %s185_s1 = inlined_call_operand.vmem [shape: f32[64,32], index: 1, kind: input, shape index: {}]   ;;  %s186_s2 = inlined_call_operand.hbm [shape: f32[16,32], index: 2, kind: output, shape index: {}]  }
   0x1   :  { %v12_v0 = vld [vmem:[%s184_s0] sm:$0xff]  ;;  %v35_v1 = vld [vmem:[%s185_s1 + $0x38] sm:$0xff]  ;;  %104 = vset.pattern.permute.xlu0 %v131_v2  ;;  %v34_v3 = vld [vmem:[%s185_s1 + $0x30] sm:$0xff] }
   0x2   :  { %51 = vmatpush.msra.mxu0 %v35_v1  ;;  %17 = vperm.xlu0 %104, %v12_v0   ;;  %v33_v4 = vld [vmem:[%s185_s1 + $0x28] sm:$0xff] }
   0x3   :  { %91 = vmatpush.msra.mxu1 %v35_v1 }
   0x4   :  { %52 = vmatpush.msra.mxu0 %v34_v3 }
   0x5   :  { %7 = vsyncpa [#allocation3], 0  ;;  %v32_v5 = vld [vmem:[%s185_s1 + $0x20] sm:$0xff]  ;;  %92 = vmatpush.msra.mxu1 %v34_v3  ;;  %v31_v6 = vld [vmem:[%s185_s1 + $0x18] sm:$0xff]  ;;  %v14_v11 = vlaneseq  ;;  %vm36_vm0 = vcmask 523264   ;;  %v132_v14 = vmov 0.0  }
   0x6   :  { %53 = vmatpush.msra.mxu0 %v33_v4  ;;  %v13_v7 = vld [vmem:[%s184_s0 + $0x8] sm:$0xff]  ;;  %v30_v8 = vld [vmem:[%s185_s1 + $0x10] sm:$0xff]  ;;  %v28_v10 = vld [vmem:[%s185_s1] sm:$0xff]  ;;  %vm66_vm3 = vcmask 261120   ;;  %s133_s0 = smov [#allocation2]   ;;  %s75_s3 = sshll.u32 %s186_s2, 4  ;;  %s76_s3 = int_to_ptr.hbm [resolvable:$true] %s75_s3 }
   0x7   :  { %93 = vmatpush.msra.mxu1 %v33_v4  ;;  %v29_v9 = vld [vmem:[%s185_s1 + $0x8] sm:$0xff]  ;;  %v15_v12 = vand.u32 127, %v14_v11  ;;  %s73_s29 = sshll.u32 %s133_s0, 4  ;;  %s134_s4 = smov 128   ;;  %s74_s29 = int_to_ptr.vmem [resolvable:$true] %s73_s29 }
   0x8   :  { %54 = vmatpush.msra.mxu0 %v32_v5  ;;  %s135_s5 = smov 8  }
   0x9   :  { %94 = vmatpush.msra.mxu1 %v32_v5 }
   0xa   :  { %55 = vmatpush.msra.mxu0 %v31_v6  ;;  %20 = vperm.xlu0 %104, %v13_v7  }
   0xb   :  { %95 = vmatpush.msra.mxu1 %v31_v6 }
   0xc   :  { %56 = vmatpush.msra.mxu0 %v30_v8 }
   0xd   :  { %96 = vmatpush.msra.mxu1 %v30_v8 }
   0xe   :  { %57 = vmatpush.msra.mxu0 %v29_v9 }
   0xf   :  { %97 = vmatpush.msra.mxu1 %v29_v9 }
  0x10   :  { %58 = vmatpush.msra.mxu0 %v28_v10 }
  0x11   :  { %98 = vmatpush.msra.mxu1 %v28_v10 }
  0x74   :  { %v18_v13 = vpop.permute.xlu0 %17 }
  0x75   :  { %vm22_vm1 = vcmp.eq.s32.totalorder %v18_v13, %v15_v12 }
  0x76   :  { %v87_v15 = vsel %vm22_vm1, 1.0, %v132_v14 }
  0x77   :  { %89 = vmatmul.msk.f32.vlgmr.msra.gmra.mxu0 %vm36_vm0, %v87_v15 }
  0x7c   :  { %v21_v16 = vpop.permute.xlu0 %20 }
  0x7d   :  { %vm23_vm2 = vcmp.eq.s32.totalorder %v21_v16, %v15_v12 }
  0x7e   :  { %v88_v17 = vsel %vm23_vm2, 1.0, %v132_v14 }
  0x7f   :  { %90 = vmatmul.msk.f32.vlgmr.msra.gmra.mxu1 %vm36_vm0, %v88_v17 }
  0xf4   :  { %v60_v18 = vpop.f32.mrf.mxu0 }
  0xf5   :  { %67 = vst.msk [vmem:[#allocation2] sm:$0xff] %vm66_vm3, %v60_v18 }
  0xfc   :  { %v63_v19 = vpop.f32.mrf.mxu1 }
  0xfd   :  { %68 = vst.msk [vmem:[#allocation2 + $0x8] sm:$0xff] %vm66_vm3, %v63_v19 }
  0xfe   :  { %81 = dma.vmem_to_hbm [thread:$0]  %s74_s29, 256, %s76_s3, [#allocation3], %s134_s4, %s134_s4, %s135_s5  }
  0xff   :  { %129 = dma.done.wait [#allocation3], 256  }
 0x100   :  { %130 = vsyncadd [#allocation3], 4294967040 }
 0x101   :  { %86 = vsyncpa [#allocation3], 1 }

</bundles_post_ra>
